<compile_context>
chip_gen: v6e
topology: v6e:2x2x1
jax: 0.10.0
libtpu: 0.0.40
codegen_flags: <defaults>
</compile_context>

<pallas_src>
import functools

import jax
import jax.numpy as jnp
from jax.experimental import pallas as pl
from jax.experimental.pallas import tpu as pltpu

HOURS = 24 * 7


# ------------------------------ kernel -----------------------------------

def _delta_kernel(len_ref, ds_ref, dt_ref, ctab_ref, out_ref, *,
                  su, tu, inv_s, inv_t):
    b = pl.program_id(0)          # batch index
    r = pl.program_id(1)          # row-tile index
    n = len_ref[b]                # valid length of this trajectory (SMEM)

    ds = ds_ref[0]                # [TL, L] f32 spatial deltas
    dt = dt_ref[0]                # [TL, L] f32 temporal deltas
    tl_rows, L = ds.shape

    # mask m[i, j] = 1.0 iff (global row i) < n and j < n  -- built once, [TL, L]
    row = jax.lax.broadcasted_iota(jnp.int32, (tl_rows, L), 0) + r * tl_rows
    col = jax.lax.broadcasted_iota(jnp.int32, (tl_rows, L), 1)
    m = jnp.logical_and(row < n, col < n).astype(jnp.float32)

    # normalized interval weights with the divide constants folded in ([TL, L])
    a_s = (su - ds) * inv_s       # = (su - ds) / (su - sl)
    a_t = (tu - dt) * inv_t       # = (tu - dt) / (tu - tl)
    ms = m * a_s
    mt = m * a_t

    c = ctab_ref[...]             # [6, E] pre-combined table rows
    E = c.shape[1]

    def crow(k):
        return c[k:k + 1, :].reshape(1, 1, E)

    out_ref[0] = (crow(0)
                  + a_s[:, :, None] * crow(1)
                  + a_t[:, :, None] * crow(2)
                  + m[:, :, None] * crow(3)
                  + ms[:, :, None] * crow(4)
                  + mt[:, :, None] * crow(5))           # [TL, L, E]


# ------------------------------ wrapper -----------------------------------

def _pick_row_tile(L, E, budget_bytes=2 << 20):
    """Largest multiple-of-8 divisor of L whose [TL, L, E] out block fits."""
    if L % 8 != 0:
        return L                  # full-array block (legal: equals array dim)
    best = 8
    for cand in range(8, L + 1, 8):
        if L % cand == 0 and cand * L * E * 4 <= budget_bytes:
            best = cand
    return best


@functools.partial(jax.jit, static_argnames=("ex", "emb_size"))
def multi_embed_forward(traj, mat, traj_len, params, ex, emb_size):
    """Pallas implementation of MultiEmbed.forward."""
    su, sl, tu, tl = ex
    emb_t, emb_l, emb_u, emb_su, emb_sl, emb_tu, emb_tl = params
    B, L, _ = traj.shape
    E = emb_size

    # ---- joint: id gathers + add, left to XLA fusion (no HBM round-trip) ----
    t_idx = (traj[:, :, 2] - 1) % HOURS + 1
    joint = (jnp.take(emb_t, t_idx, axis=0)
             + jnp.take(emb_l, traj[:, :, 1], axis=0)
             + jnp.take(emb_u, traj[:, :, 0], axis=0))          # [B, L, E]

    # ---- pre-combine the four 2-row tables into six [E] vectors ----
    d_sl = emb_sl[1] - emb_sl[0]
    d_su = emb_su[1] - emb_su[0]
    d_tl = emb_tl[1] - emb_tl[0]
    d_tu = emb_tu[1] - emb_tu[0]
    ctab = jnp.stack([emb_su[0] + emb_tu[0],       # c0
                      emb_sl[0] - emb_su[0],       # c1
                      emb_tl[0] - emb_tu[0],       # c2
                      d_su + d_tu,                 # c3
                      d_sl - d_su,                 # c4
                      d_tl - d_tu], axis=0)        # c5  -> [6, E]
    ctab = ctab.astype(jnp.float32)

    delta_s = mat[:, :, :, 0]
    delta_t = mat[:, :, :, 1]

    TL = _pick_row_tile(L, E)
    inv_s = 1.0 / (float(su) - float(sl))
    inv_t = 1.0 / (float(tu) - float(tl))
    kernel = functools.partial(_delta_kernel, su=float(su), tu=float(tu),
                               inv_s=inv_s, inv_t=inv_t)

    delta = pl.pallas_call(
        kernel,
        out_shape=jax.ShapeDtypeStruct((B, L, L, E), jnp.float32),
        grid_spec=pltpu.PrefetchScalarGridSpec(
            num_scalar_prefetch=1,                      # traj_len -> SMEM
            grid=(B, L // TL),
            in_specs=[
                pl.BlockSpec((1, TL, L), lambda b, r, ln: (b, r, 0)),
                pl.BlockSpec((1, TL, L), lambda b, r, ln: (b, r, 0)),
                pl.BlockSpec((6, E), lambda b, r, ln: (0, 0)),
            ],
            out_specs=pl.BlockSpec((1, TL, L, E),
                                   lambda b, r, ln: (b, r, 0, 0)),
        ),
        compiler_params=pltpu.CompilerParams(
            dimension_semantics=("parallel", "parallel"),
            vmem_limit_bytes=32 * 1024 * 1024),
    )(traj_len, delta_s, delta_t, ctab)

    return joint, delta


# ------------------------------ reference ---------------------------------

def ref_forward(traj, mat, traj_len, params, ex, emb_size):
    su, sl, tu, tl = ex
    emb_t, emb_l, emb_u, emb_su, emb_sl, emb_tu, emb_tl = params
    B, L, _ = traj.shape

    t_idx = (traj[:, :, 2] - 1) % HOURS + 1
    joint = (jnp.take(emb_t, t_idx, axis=0)
             + jnp.take(emb_l, traj[:, :, 1], axis=0)
             + jnp.take(emb_u, traj[:, :, 0], axis=0))

    delta_s = mat[:, :, :, 0]
    delta_t = mat[:, :, :, 1]
    idx = jnp.arange(L)
    mask = ((idx[None, :, None] < traj_len[:, None, None])
            & (idx[None, None, :] < traj_len[:, None, None])).astype(jnp.int32)
    esl = jnp.take(emb_sl, mask, axis=0)
    esu = jnp.take(emb_su, mask, axis=0)
    etl = jnp.take(emb_tl, mask, axis=0)
    etu = jnp.take(emb_tu, mask, axis=0)

    vsl = (delta_s - sl)[..., None]
    vsu = (su - delta_s)[..., None]
    vtl = (delta_t - tl)[..., None]
    vtu = (tu - delta_t)[..., None]
    space = (esl * vsu + esu * vsl) / (su - sl)
    time_i = (etl * vtu + etu * vtl) / (tu - tl)
    return joint, space + time_i


# -------------------------------- main -------------------------------------

if __name__ == "__main__":
    B, L, E = 2, 8, 32
    n_user, n_loc, n_time = 5, 20, HOURS + 1
    ex = (10.0, 0.0, 100.0, 0.0)          # (su, sl, tu, tl)

    key = jax.random.PRNGKey(0)
    keys = jax.random.split(key, 12)

    # deterministic "nn.Embedding" tables
    emb_t = jax.random.normal(keys[0], (n_time, E), jnp.float32)
    emb_l = jax.random.normal(keys[1], (n_loc, E), jnp.float32)
    emb_u = jax.random.normal(keys[2], (n_user, E), jnp.float32)
    emb_su = jax.random.normal(keys[3], (2, E), jnp.float32)
    emb_sl = jax.random.normal(keys[4], (2, E), jnp.float32)
    emb_tu = jax.random.normal(keys[5], (2, E), jnp.float32)
    emb_tl = jax.random.normal(keys[6], (2, E), jnp.float32)
    params = (emb_t, emb_l, emb_u, emb_su, emb_sl, emb_tu, emb_tl)

    # deterministic inputs
    user_ids = jax.random.randint(keys[7], (B, L, 1), 0, n_user, jnp.int32)
    loc_ids = jax.random.randint(keys[8], (B, L, 1), 1, n_loc, jnp.int32)
    time_ids = jax.random.randint(keys[9], (B, L, 1), 1, 400, jnp.int32)
    traj = jnp.concatenate([user_ids, loc_ids, time_ids], axis=-1)   # [B, L, 3]

    mat = jnp.stack(
        [jax.random.uniform(keys[10], (B, L, L), jnp.float32, 0.0, ex[0]),
         jax.random.uniform(keys[11], (B, L, L), jnp.float32, 0.0, ex[2])],
        axis=-1)                                                      # [B, L, L, 2]
    traj_len = jnp.array([L, 5], dtype=jnp.int32)

    joint, delta = multi_embed_forward(traj, mat, traj_len,
                                       params=params, ex=ex, emb_size=E)
    jax.block_until_ready((joint, delta))

    joint_ref, delta_ref = ref_forward(traj, mat, traj_len, params, ex, E)
    assert joint.shape == (B, L, E) and delta.shape == (B, L, L, E)
    assert jnp.allclose(joint, joint_ref, rtol=1e-5, atol=1e-5)
    assert jnp.allclose(delta, delta_ref, rtol=1e-4, atol=1e-4)

    print("KERNEL_OK")
</pallas_src>

<mosaic_0001>
module attributes {stable_mosaic.version = 11 : i64} {
  func.func @_delta_kernel(%arg0: i32, %arg1: i32, %arg2: memref<2xi32, #tpu.memory_space<smem>>, %arg3: memref<1x8x8xf32, #tpu.memory_space<vmem>>, %arg4: memref<1x8x8xf32, #tpu.memory_space<vmem>>, %arg5: memref<6x32xf32, #tpu.memory_space<vmem>>, %arg6: memref<1x8x8x32xf32, #tpu.memory_space<vmem>>) attributes {dimension_semantics = [#tpu.dimension_semantics<parallel>, #tpu.dimension_semantics<parallel>], iteration_bounds = array<i64: 2, 1>, scalar_prefetch = 1 : i64, scratch_operands = 0 : i64, tpu.core_type = #tpu.core_type<tc>, window_params = [{transform_indices = @transform_0, window_bounds = array<i64: 1, 8, 8>}, {transform_indices = @transform_1, window_bounds = array<i64: 1, 8, 8>}, {pipeline_mode = #tpu.pipeline_mode<synchronous>, transform_indices = @transform_2, window_bounds = array<i64: 6, 32>}, {transform_indices = @transform_3, window_bounds = array<i64: 1, 8, 8, 32>}]} {
    %0 = arith.index_cast %arg0 : i32 to index
    %1 = memref.load %arg2[%0] : memref<2xi32, #tpu.memory_space<smem>>
    %c0 = arith.constant 0 : index
    %c0_0 = arith.constant 0 : index
    %c0_1 = arith.constant 0 : index
    %2 = vector.load %arg3[%c0, %c0_0, %c0_1] : memref<1x8x8xf32, #tpu.memory_space<vmem>>, vector<1x8x8xf32>
    %3 = vector.shape_cast %2 : vector<1x8x8xf32> to vector<8x8xf32>
    %c0_2 = arith.constant 0 : index
    %c0_3 = arith.constant 0 : index
    %c0_4 = arith.constant 0 : index
    %4 = vector.load %arg4[%c0_2, %c0_3, %c0_4] : memref<1x8x8xf32, #tpu.memory_space<vmem>>, vector<1x8x8xf32>
    %5 = vector.shape_cast %4 : vector<1x8x8xf32> to vector<8x8xf32>
    %6 = tpu.iota {dimensions = array<i32: 0>} : vector<8x8xi32>
    %c8_i32 = arith.constant 8 : i32
    %7 = arith.muli %arg1, %c8_i32 : i32
    %8 = vector.broadcast %7 : i32 to vector<8x8xi32>
    %9 = arith.addi %6, %8 : vector<8x8xi32>
    %10 = tpu.iota {dimensions = array<i32: 1>} : vector<8x8xi32>
    %11 = vector.broadcast %1 : i32 to vector<8x8xi32>
    %12 = arith.cmpi slt, %9, %11 : vector<8x8xi32>
    %13 = vector.broadcast %1 : i32 to vector<8x8xi32>
    %14 = arith.cmpi slt, %10, %13 : vector<8x8xi32>
    %15 = arith.andi %12, %14 : vector<8x8xi1>
    %16 = arith.extui %15 : vector<8x8xi1> to vector<8x8xi32>
    %17 = arith.sitofp %16 : vector<8x8xi32> to vector<8x8xf32>
    %cst = arith.constant 1.000000e+01 : f32
    %18 = vector.broadcast %cst : f32 to vector<8x8xf32>
    %19 = arith.subf %18, %3 : vector<8x8xf32>
    %cst_5 = arith.constant 1.000000e-01 : f32
    %20 = vector.broadcast %cst_5 : f32 to vector<8x8xf32>
    %21 = arith.mulf %19, %20 : vector<8x8xf32>
    %cst_6 = arith.constant 1.000000e+02 : f32
    %22 = vector.broadcast %cst_6 : f32 to vector<8x8xf32>
    %23 = arith.subf %22, %5 : vector<8x8xf32>
    %cst_7 = arith.constant 0.00999999977 : f32
    %24 = vector.broadcast %cst_7 : f32 to vector<8x8xf32>
    %25 = arith.mulf %23, %24 : vector<8x8xf32>
    %26 = arith.mulf %17, %21 : vector<8x8xf32>
    %27 = arith.mulf %17, %25 : vector<8x8xf32>
    %c0_8 = arith.constant 0 : index
    %c0_9 = arith.constant 0 : index
    %28 = vector.load %arg5[%c0_8, %c0_9] : memref<6x32xf32, #tpu.memory_space<vmem>>, vector<6x32xf32>
    %29 = vector.extract_strided_slice %28 {offsets = [0, 0], sizes = [1, 32], strides = [1, 1]} : vector<6x32xf32> to vector<1x32xf32>
    %30 = vector.shape_cast %29 : vector<1x32xf32> to vector<1x1x32xf32>
    %31 = vector.shape_cast %21 : vector<8x8xf32> to vector<8x8x1xf32>
    %32 = vector.extract_strided_slice %28 {offsets = [1, 0], sizes = [1, 32], strides = [1, 1]} : vector<6x32xf32> to vector<1x32xf32>
    %33 = vector.shape_cast %32 : vector<1x32xf32> to vector<1x1x32xf32>
    %34 = vector.broadcast %31 : vector<8x8x1xf32> to vector<8x8x32xf32>
    %35 = vector.broadcast %33 : vector<1x1x32xf32> to vector<8x8x32xf32>
    %36 = arith.mulf %34, %35 : vector<8x8x32xf32>
    %37 = vector.broadcast %30 : vector<1x1x32xf32> to vector<8x8x32xf32>
    %38 = arith.addf %37, %36 : vector<8x8x32xf32>
    %39 = vector.shape_cast %25 : vector<8x8xf32> to vector<8x8x1xf32>
    %40 = vector.extract_strided_slice %28 {offsets = [2, 0], sizes = [1, 32], strides = [1, 1]} : vector<6x32xf32> to vector<1x32xf32>
    %41 = vector.shape_cast %40 : vector<1x32xf32> to vector<1x1x32xf32>
    %42 = vector.broadcast %39 : vector<8x8x1xf32> to vector<8x8x32xf32>
    %43 = vector.broadcast %41 : vector<1x1x32xf32> to vector<8x8x32xf32>
    %44 = arith.mulf %42, %43 : vector<8x8x32xf32>
    %45 = arith.addf %38, %44 : vector<8x8x32xf32>
    %46 = vector.shape_cast %17 : vector<8x8xf32> to vector<8x8x1xf32>
    %47 = vector.extract_strided_slice %28 {offsets = [3, 0], sizes = [1, 32], strides = [1, 1]} : vector<6x32xf32> to vector<1x32xf32>
    %48 = vector.shape_cast %47 : vector<1x32xf32> to vector<1x1x32xf32>
    %49 = vector.broadcast %46 : vector<8x8x1xf32> to vector<8x8x32xf32>
    %50 = vector.broadcast %48 : vector<1x1x32xf32> to vector<8x8x32xf32>
    %51 = arith.mulf %49, %50 : vector<8x8x32xf32>
    %52 = arith.addf %45, %51 : vector<8x8x32xf32>
    %53 = vector.shape_cast %26 : vector<8x8xf32> to vector<8x8x1xf32>
    %54 = vector.extract_strided_slice %28 {offsets = [4, 0], sizes = [1, 32], strides = [1, 1]} : vector<6x32xf32> to vector<1x32xf32>
    %55 = vector.shape_cast %54 : vector<1x32xf32> to vector<1x1x32xf32>
    %56 = vector.broadcast %53 : vector<8x8x1xf32> to vector<8x8x32xf32>
    %57 = vector.broadcast %55 : vector<1x1x32xf32> to vector<8x8x32xf32>
    %58 = arith.mulf %56, %57 : vector<8x8x32xf32>
    %59 = arith.addf %52, %58 : vector<8x8x32xf32>
    %60 = vector.shape_cast %27 : vector<8x8xf32> to vector<8x8x1xf32>
    %61 = vector.extract_strided_slice %28 {offsets = [5, 0], sizes = [1, 32], strides = [1, 1]} : vector<6x32xf32> to vector<1x32xf32>
    %62 = vector.shape_cast %61 : vector<1x32xf32> to vector<1x1x32xf32>
    %63 = vector.broadcast %60 : vector<8x8x1xf32> to vector<8x8x32xf32>
    %64 = vector.broadcast %62 : vector<1x1x32xf32> to vector<8x8x32xf32>
    %65 = arith.mulf %63, %64 : vector<8x8x32xf32>
    %66 = arith.addf %59, %65 : vector<8x8x32xf32>
    %c0_10 = arith.constant 0 : index
    %c0_11 = arith.constant 0 : index
    %c0_12 = arith.constant 0 : index
    %c0_13 = arith.constant 0 : index
    %67 = vector.load %arg6[%c0_10, %c0_11, %c0_12, %c0_13] : memref<1x8x8x32xf32, #tpu.memory_space<vmem>>, vector<1x8x8x32xf32>
    %68 = vector.shape_cast %67 : vector<1x8x8x32xf32> to vector<8x8x32xf32>
    %69 = vector.shape_cast %66 : vector<8x8x32xf32> to vector<1x8x8x32xf32>
    tpu.vector_store %arg6[%c0_10, %c0_11, %c0_12, %c0_13], %69 {strides = array<i32>} : memref<1x8x8x32xf32, #tpu.memory_space<vmem>>, vector<1x8x8x32xf32>,
    return
  }
  func.func @transform_0(%arg0: i32, %arg1: i32, %arg2: memref<2xi32, #tpu.memory_space<smem>>) -> (i32, i32, i32) {
    %c0_i32 = arith.constant 0 : i32
    %c0_i32_0 = arith.constant 0 : i32
    return %arg0, %arg1, %c0_i32 : i32, i32, i32
  }
  func.func @transform_1(%arg0: i32, %arg1: i32, %arg2: memref<2xi32, #tpu.memory_space<smem>>) -> (i32, i32, i32) {
    %c0_i32 = arith.constant 0 : i32
    %c0_i32_0 = arith.constant 0 : i32
    return %arg0, %arg1, %c0_i32 : i32, i32, i32
  }
  func.func @transform_2(%arg0: i32, %arg1: i32, %arg2: memref<2xi32, #tpu.memory_space<smem>>) -> (i32, i32) {
    %c0_i32 = arith.constant 0 : i32
    %c0_i32_0 = arith.constant 0 : i32
    %c0_i32_1 = arith.constant 0 : i32
    return %c0_i32, %c0_i32_0 : i32, i32
  }
  func.func @transform_3(%arg0: i32, %arg1: i32, %arg2: memref<2xi32, #tpu.memory_space<smem>>) -> (i32, i32, i32, i32) {
    %c0_i32 = arith.constant 0 : i32
    %c0_i32_0 = arith.constant 0 : i32
    %c0_i32_1 = arith.constant 0 : i32
    return %arg0, %arg1, %c0_i32, %c0_i32_0 : i32, i32, i32, i32
  }
}

</mosaic_0001>

<bundles_post_ra>
// kernel: multi_embed_forward.1
= control target key start
LH: loop header
LB: loop body
LE: loop exit
PB: predicated region body
PF: predicated region fallthrough
CT: control target
= control target key end

     0   :  { %s1163_s0 = inlined_call_operand.vmem [shape: s32[2], index: 0, kind: input, shape index: {}]   ;;  %s1164_s1 = inlined_call_operand.vmem [shape: f32[2,8,8], index: 1, kind: input, shape index: {}]   ;;  %s1165_s2 = inlined_call_operand.vmem [shape: f32[2,8,8], index: 2, kind: input, shape index: {}]   ;;  %s1166_s3 = inlined_call_operand.vmem [shape: f32[6,32], index: 3, kind: input, shape index: {}]   ;;  %s1167_s4 = inlined_call_operand.hbm [shape: f32[2,8,8,32], index: 4, kind: output, shape index: {}]  }
   0x1   :  { %s9_s17 = sshll.u32 %s1163_s0, 4  ;;  %s10_s17 = int_to_ptr.vmem [resolvable:$true] %s9_s17 }
   0x2   :  { %s824_s18 = scalar_lea.vmem %s10_s17, 16  ;;  %p829_p1 = scmp.lt.s32.totalorder %s10_s17, %s10_s17 }
   0x3   :  { %p825_p0 = scmp.ne.s32.totalorder %s10_s17, %s824_s18  ;;  %p830_p2 = scmp.lt.s32.totalorder %s824_s18, %s824_s18 }
   0x5   :  { %p831_p3 = por %p830_p2, %p829_p1 }
   0x7   :  { %p832_p4 = pnand %p831_p3, %p825_p0 }
   0x9   :  { %835 = shalt.err (!%p832_p4)  }
   0xa   :  { %s916_s19 = smov [#allocation3]  }
   0xb   :  { %12 = dma.vmem_to_smem %s10_s17, 16, %s916_s19, [#allocation2] }
   0xc   :  { %886 = dma.done.wait [#allocation2], 16 }
   0xd   :  { %887 = vsyncadd [#allocation2], 4294967280 }
   0xe   :  { %14 = sfence }
   0xf   :  { %15 = vsyncpa [#allocation5], 0 }
  0x10   :  { %17 = vsyncpa [#allocation5 + $0x1], 0  ;;  %s949_s20 = smov 0   ;;  %s951_s21 = smov 0  }
  0x11   :  { %s953_s0 = smov 0   ;;  %s955_s22 = smov 0  }
  0x12   :  { %s957_s23 = smov 0   ;;  %s959_s24 = smov 0  }
  0x13 LB: > { %s750_s25 = sadd.s32 4294967295, %s914_s24   ;;  %s751_s26 = sadd.s32 4294967294, %s914_s24   ;;  %s914_s24 = sphi %s959_s24, %s23_s24   ;;  %s910_s23 = sphi %s957_s23, %s1174_s23   ;;  %s906_s22 = sphi %s955_s22, %s1173_s22   ;;  %s902_s0 = sphi %s953_s0, %s1172_s0   ;;  %s898_s21 = sphi %s951_s21, %s1171_s21   ;;  %s894_s20 = sphi %s949_s20, %s1170_s20  }
  0x14   : > { %s35_s27 = sadd.s32 1, %s910_s23  ;;  %s121_s28 = sadd.s32 1, %s902_s0 }
  0x15   : > { %p37_p5 = scmp.ge.s32.totalorder %s35_s27, 2  ;;  %p131_p6 = scmp.ne.s32.totalorder %s902_s0, %s898_s21 }
  0x16   : > { %p132_p7 = scmp.eq.s32.totalorder %s750_s25, 1  ;;  %p137_p8 = scmp.ne.s32.totalorder %s898_s21, %s894_s20 }
  0x17   : > { %s1176_s27 = smov (%p37_p5, %s35_s27), 0  ;;  %p138_p10 = scmp.eq.s32.totalorder %s751_s26, 1 }
  0x18   : > { %p989_p9 = por %p132_p7, %p131_p6  ;;  %s116_s30 = ssub.s32 %s910_s23, %s1176_s27 }
  0x19   : > { %p754_p11 = scmp.ge.s32.totalorder %s914_s24, 1  ;;  %p119_p12 = scmp.eq.s32.totalorder %s116_s30, 0 }
  0x1a   : > { %p996_p13 = por %p138_p10, %p137_p8  ;;  %p179_p0 = scmp.lt.s32.totalorder %s914_s24, 3 }
  0x1b   : > { %s1002_s6 = scalar_select %p119_p12, %s902_s0, %s121_s28  }
  0x1c   : > { %p180_p1 = pnand %p754_p11, %p179_p0 }
  0x1d   : > { %p212_p2 = scmp.lt.s32.totalorder (!%p180_p1), %s906_s22, 1  ;;  %s227_s15 = sld [smem:[#allocation3 + %s906_s22]] (!%p180_p1) }
  0x1e   : > { %183 = sbr.rel (%p180_p1) target bundleno = 255 (0xff), region = 32  ;;  %s209_s18 = sand.u32 (!%p180_p1), 1, %s898_s21  }
  0x1f   : > { %s755_s19 = sshll.u32 (!%p180_p1), %s209_s18, 6  ;;  %s764_s26 = sshll.u32 (!%p180_p1), %s906_s22, 10 }
  0x20   : > { %s211_s25 = scalar_lea.vmem (!%p180_p1), [#allocation4], %s755_s19  ;;  %s918_s10 = smov (!%p180_p1), [#allocation4]  }
  0x21   : > { %s659_s28 = sshll.u32 (!%p180_p1), %s211_s25, 4  ;;  %s1112_s28 = int_to_ptr.vmem [resolvable:$true] %s659_s28 }
  0x22   : > { %s836_s9 = scalar_lea.vmem (!%p180_p1), %s1112_s28, 1024 }
  0x23   : > { %v230_v0 = vlaneseq  ;;  %s213_s7 = scalar_select %p212_p2, %s906_s22, 1  ;;  %v237_v29 = vstv %s227_s15  ;;  %v917_v34 = vmov 0.0   ;;  %v1083_v62 = vld [vmem:[%s1166_s3] sm:$0x3f]  ;;  %vm634_vm3 = vcmask 261120  }
  0x24   : > { %s1118_s22 = scalar_lea.sflag [#allocation5], %s209_s18  ;;  %p837_p3 = scmp.ne.s32.totalorder %s1112_s28, %s836_s9 }
  0x25   : > { %v231_v1 = vshrl.u32 %v230_v0, 7  ;;  %s756_s8 = sshll.u32 %s213_s7, 3  ;;  %v236_v26 = vand.u32 127, %v230_v0 }
  0x26   : > { %s218_s11 = scalar_lea.vmem %s1164_s1, %s756_s8  ;;  %s225_s14 = scalar_lea.vmem %s1165_s2, %s756_s8 }
  0x27   : > { %v228_v2 = vld [vmem:[%s218_s11] sm:$0xff]  ;;  %v1009_v4 = vsub.s32 2, %v231_v1  ;;  %v1011_v5 = vsub.s32 0, %v231_v1  ;;  %v1015_v7 = vsub.s32 3, %v231_v1  ;;  %v1017_v8 = vsub.s32 1, %v231_v1  ;;  %s1110_s8 = scalar_lea.hbm %s1167_s4, %s764_s26  ;;  %p838_p4 = pnand %p837_p3, %p989_p9 }
  0x28   : > { %v243_v3 = vsub.f32 10.0, %v228_v2  ;;  %v1030_v13 = vsub.s32 5, %v231_v1  ;;  %v1032_v14 = vsub.s32 4, %v231_v1  ;;  %v229_v15 = vld [vmem:[%s225_s14] sm:$0xff]  ;;  %v1034_v16 = vsub.s32 7, %v231_v1  ;;  %s840_s11 = sshll.u32 %s918_s10, 4  ;;  %s841_s11 = int_to_ptr.vmem [resolvable:$false] %s840_s11 }
  0x29   : > { %v1040_v19 = vsub.s32 6, %v231_v1  ;;  %v245_v20 = vsub.f32 100.0, %v229_v15  ;;  %vm238_vm0 = vcmp.lt.s32.totalorder %v231_v1, %v237_v29  ;;  %vm239_vm1 = vcmp.lt.s32.totalorder %v236_v26, %v237_v29  ;;  %p839_p5 = pneg %p838_p4  ;;  %s842_s12 = scalar_lea.vmem %s841_s11, 2048 }
  0x2a   : > { %v1013_v6 = vmul.f32 0.1, %v243_v3  ;;  %vm240_vm2 = vmand %vm238_vm0, %vm239_vm1  ;;  %v309_v63 = vrot.slane %v1083_v62, %v1017_v8  ;;  %v321_v0 = vrot.slane %v1083_v62, %v1011_v5  ;;  %p843_p6 = scmp.lt.s32.totalorder %s1112_s28, %s841_s11  ;;  %p844_p7 = scmp.lt.s32.totalorder %s842_s12, %s836_s9 }
  0x2b   : > { %v246_v23 = vmul.f32 0.01, %v245_v20  ;;  %v758_v35 = vsel %vm240_vm2, 1.0, %v917_v34 }
  0x2c   : > { %v267_v9 = vrot.slane %v1013_v6, %v1009_v4  ;;  %v253_v10 = vrot.slane %v1013_v6, %v1011_v5  ;;  %v274_v11 = vrot.slane %v1013_v6, %v1015_v7  ;;  %v260_v12 = vrot.slane %v1013_v6, %v1017_v8  ;;  %p845_p8 = por %p844_p7, %p843_p6 }
  0x2d   : > { %v288_v17 = vrot.slane %v1013_v6, %v1030_v13  ;;  %v281_v18 = vrot.slane %v1013_v6, %v1032_v14  ;;  %v302_v21 = vrot.slane %v1013_v6, %v1034_v16  ;;  %v295_v22 = vrot.slane %v1013_v6, %v1040_v19 }
  0x2e   : > { %269 = vbcast.lane.b32.xlu1 %v267_v9, 256  ;;  %255 = vbcast.lane.b32.xlu0 %v253_v10, 256  ;;  %v340_v24 = vrot.slane %v246_v23, %v1017_v8  ;;  %v333_v25 = vrot.slane %v246_v23, %v1011_v5  ;;  %v354_v27 = vrot.slane %v246_v23, %v1015_v7  ;;  %p846_p10 = pnand %p845_p8, %p839_p5 }
  0x2f   : > { %v347_v28 = vrot.slane %v246_v23, %v1009_v4  ;;  %v368_v30 = vrot.slane %v246_v23, %v1030_v13  ;;  %v361_v31 = vrot.slane %v246_v23, %v1032_v14  ;;  %v382_v32 = vrot.slane %v246_v23, %v1034_v16 }
  0x30   : > { %v375_v33 = vrot.slane %v246_v23, %v1040_v19  ;;  %v416_v36 = vrot.slane %v758_v35, %v1017_v8  ;;  %v409_v37 = vrot.slane %v758_v35, %v1011_v5  ;;  %v430_v38 = vrot.slane %v758_v35, %v1015_v7 }
  0x31   : > { %v423_v39 = vrot.slane %v758_v35, %v1009_v4  ;;  %v444_v40 = vrot.slane %v758_v35, %v1030_v13  ;;  %v437_v41 = vrot.slane %v758_v35, %v1032_v14  ;;  %v458_v42 = vrot.slane %v758_v35, %v1034_v16 }
  0x32   : > { %276 = vbcast.lane.b32.xlu1 %v274_v11, 256  ;;  %262 = vbcast.lane.b32.xlu0 %v260_v12, 256  ;;  %v451_v43 = vrot.slane %v758_v35, %v1040_v19  ;;  %v247_v44 = vmul.f32 %v758_v35, %v1013_v6  ;;  %v248_v53 = vmul.f32 %v758_v35, %v246_v23 }
  0x34   : > { %v492_v45 = vrot.slane %v247_v44, %v1017_v8  ;;  %v485_v46 = vrot.slane %v247_v44, %v1011_v5  ;;  %v506_v47 = vrot.slane %v247_v44, %v1015_v7  ;;  %v499_v48 = vrot.slane %v247_v44, %v1009_v4 }
  0x35   : > { %v520_v49 = vrot.slane %v247_v44, %v1030_v13  ;;  %v513_v50 = vrot.slane %v247_v44, %v1032_v14  ;;  %v534_v51 = vrot.slane %v247_v44, %v1034_v16  ;;  %v527_v52 = vrot.slane %v247_v44, %v1040_v19 }
  0x36   : > { %290 = vbcast.lane.b32.xlu1 %v288_v17, 256  ;;  %283 = vbcast.lane.b32.xlu0 %v281_v18, 256  ;;  %v568_v54 = vrot.slane %v248_v53, %v1017_v8  ;;  %v561_v55 = vrot.slane %v248_v53, %v1011_v5  ;;  %v582_v56 = vrot.slane %v248_v53, %v1015_v7 }
  0x37   : > { %v575_v57 = vrot.slane %v248_v53, %v1009_v4  ;;  %v596_v58 = vrot.slane %v248_v53, %v1030_v13  ;;  %v589_v59 = vrot.slane %v248_v53, %v1032_v14  ;;  %v610_v60 = vrot.slane %v248_v53, %v1034_v16 }
  0x38   : > { %v603_v61 = vrot.slane %v248_v53, %v1040_v19 }
  0x3a   : > { %304 = vbcast.lane.b32.xlu1 %v302_v21, 256  ;;  %297 = vbcast.lane.b32.xlu0 %v295_v22, 256 }
  0x3e   : > { %342 = vbcast.lane.b32.xlu1 %v340_v24, 256  ;;  %335 = vbcast.lane.b32.xlu0 %v333_v25, 256 }
  0x42   : > { %356 = vbcast.lane.b32.xlu1 %v354_v27, 256  ;;  %349 = vbcast.lane.b32.xlu0 %v347_v28, 256  ;;  %v389_v27 = vrot.slane %v1083_v62, %v1009_v4 }
  0x46   : > { %370 = vbcast.lane.b32.xlu1 %v368_v30, 256  ;;  %363 = vbcast.lane.b32.xlu0 %v361_v31, 256 }
  0x4a   : > { %384 = vbcast.lane.b32.xlu1 %v382_v32, 256  ;;  %377 = vbcast.lane.b32.xlu0 %v375_v33, 256 }
  0x4e   : > { %418 = vbcast.lane.b32.xlu1 %v416_v36, 256  ;;  %411 = vbcast.lane.b32.xlu0 %v409_v37, 256 }
  0x52   : > { %432 = vbcast.lane.b32.xlu1 %v430_v38, 256  ;;  %425 = vbcast.lane.b32.xlu0 %v423_v39, 256 }
  0x56   : > { %446 = vbcast.lane.b32.xlu1 %v444_v40, 256  ;;  %439 = vbcast.lane.b32.xlu0 %v437_v41, 256 }
  0x5a   : > { %460 = vbcast.lane.b32.xlu1 %v458_v42, 256  ;;  %453 = vbcast.lane.b32.xlu0 %v451_v43, 256 }
  0x5e   : > { %494 = vbcast.lane.b32.xlu1 %v492_v45, 256  ;;  %487 = vbcast.lane.b32.xlu0 %v485_v46, 256 }
  0x62   : > { %508 = vbcast.lane.b32.xlu1 %v506_v47, 256  ;;  %501 = vbcast.lane.b32.xlu0 %v499_v48, 256 }
  0x66   : > { %522 = vbcast.lane.b32.xlu1 %v520_v49, 256  ;;  %515 = vbcast.lane.b32.xlu0 %v513_v50, 256 }
  0x6a   : > { %536 = vbcast.lane.b32.xlu1 %v534_v51, 256  ;;  %529 = vbcast.lane.b32.xlu0 %v527_v52, 256  ;;  %v465_v51 = vrot.slane %v1083_v62, %v1015_v7 }
  0x6e   : > { %570 = vbcast.lane.b32.xlu1 %v568_v54, 256  ;;  %563 = vbcast.lane.b32.xlu0 %v561_v55, 256 }
  0x72   : > { %584 = vbcast.lane.b32.xlu1 %v582_v56, 256  ;;  %577 = vbcast.lane.b32.xlu0 %v575_v57, 256 }
  0x76   : > { %598 = vbcast.lane.b32.xlu1 %v596_v58, 256  ;;  %591 = vbcast.lane.b32.xlu0 %v589_v59, 256 }
  0x7a   : > { %612 = vbcast.lane.b32.xlu1 %v610_v60, 256  ;;  %605 = vbcast.lane.b32.xlu0 %v603_v61, 256 }
  0xa0   : > { %v270_v1 = vpop.permute.xlu1 %269  ;;  %v256_v2 = vpop.permute.xlu0 %255 }
  0xa1   : > { %v312_v3 = vmul.f32 %v309_v63, %v270_v1  ;;  %v310_v6 = vmul.f32 %v309_v63, %v256_v2 }
  0xa3   : > { %v324_v9 = vadd.f32 %v321_v0, %v312_v3  ;;  %v322_v10 = vadd.f32 %v321_v0, %v310_v6 }
  0xa4   : > { %v277_v11 = vpop.permute.xlu1 %276  ;;  %v263_v12 = vpop.permute.xlu0 %262 }
  0xa5   : > { %v313_v15 = vmul.f32 %v309_v63, %v277_v11  ;;  %v311_v16 = vmul.f32 %v309_v63, %v263_v12 }
  0xa7   : > { %v325_v17 = vadd.f32 %v321_v0, %v313_v15  ;;  %v323_v18 = vadd.f32 %v321_v0, %v311_v16 }
  0xa8   : > { %v291_v19 = vpop.permute.xlu1 %290  ;;  %v284_v20 = vpop.permute.xlu0 %283 }
  0xa9   : > { %v315_v21 = vmul.f32 %v309_v63, %v291_v19  ;;  %v314_v22 = vmul.f32 %v309_v63, %v284_v20 }
  0xab   : > { %v327_v8 = vadd.f32 %v321_v0, %v315_v21  ;;  %v326_v23 = vadd.f32 %v321_v0, %v314_v22 }
  0xac   : > { %v305_v24 = vpop.permute.xlu1 %304  ;;  %v298_v5 = vpop.permute.xlu0 %297 }
  0xad   : > { %v317_v25 = vmul.f32 %v309_v63, %v305_v24  ;;  %v316_v26 = vmul.f32 %v309_v63, %v298_v5 }
  0xaf   : > { %v329_v28 = vadd.f32 %v321_v0, %v317_v25  ;;  %v328_v29 = vadd.f32 %v321_v0, %v316_v26 }
  0xb0   : > { %v343_v30 = vpop.permute.xlu1 %342  ;;  %v336_v31 = vpop.permute.xlu0 %335 }
  0xb1   : > { %v391_v32 = vmul.f32 %v389_v27, %v343_v30  ;;  %v390_v33 = vmul.f32 %v389_v27, %v336_v31 }
  0xb3   : > { %v399_v34 = vadd.f32 %v391_v32, %v323_v18  ;;  %v398_v35 = vadd.f32 %v390_v33, %v322_v10  ;;  %v541_v18 = vrot.slane %v1083_v62, %v1032_v14 }
  0xb4   : > { %v357_v36 = vpop.permute.xlu1 %356  ;;  %v350_v37 = vpop.permute.xlu0 %349 }
  0xb5   : > { %v393_v38 = vmul.f32 %v389_v27, %v357_v36  ;;  %v392_v39 = vmul.f32 %v389_v27, %v350_v37 }
  0xb7   : > { %v401_v40 = vadd.f32 %v393_v38, %v325_v17  ;;  %v400_v41 = vadd.f32 %v392_v39, %v324_v9 }
  0xb8   : > { %v371_v42 = vpop.permute.xlu1 %370  ;;  %v364_v43 = vpop.permute.xlu0 %363 }
  0xb9   : > { %v395_v44 = vmul.f32 %v389_v27, %v371_v42  ;;  %v394_v45 = vmul.f32 %v389_v27, %v364_v43 }
  0xbb   : > { %v403_v46 = vadd.f32 %v395_v44, %v327_v8  ;;  %v402_v4 = vadd.f32 %v394_v45, %v326_v23 }
  0xbc   : > { %v385_v47 = vpop.permute.xlu1 %384  ;;  %v378_v48 = vpop.permute.xlu0 %377 }
  0xbd   : > { %v397_v49 = vmul.f32 %v389_v27, %v385_v47  ;;  %v396_v50 = vmul.f32 %v389_v27, %v378_v48 }
  0xbf   : > { %v405_v52 = vadd.f32 %v397_v49, %v329_v28  ;;  %v404_v53 = vadd.f32 %v396_v50, %v328_v29 }
  0xc0   : > { %v419_v54 = vpop.permute.xlu1 %418  ;;  %v412_v55 = vpop.permute.xlu0 %411 }
  0xc1   : > { %v467_v56 = vmul.f32 %v465_v51, %v419_v54  ;;  %v466_v57 = vmul.f32 %v465_v51, %v412_v55 }
  0xc3   : > { %v475_v58 = vadd.f32 %v467_v56, %v399_v34  ;;  %v474_v59 = vadd.f32 %v466_v57, %v398_v35 }
  0xc4   : > { %v433_v60 = vpop.permute.xlu1 %432  ;;  %v426_v61 = vpop.permute.xlu0 %425 }
  0xc5   : > { %v469_v63 = vmul.f32 %v465_v51, %v433_v60  ;;  %v468_v0 = vmul.f32 %v465_v51, %v426_v61 }
  0xc7   : > { %v477_v1 = vadd.f32 %v469_v63, %v401_v40  ;;  %v476_v2 = vadd.f32 %v468_v0, %v400_v41  ;;  %v617_v40 = vrot.slane %v1083_v62, %v1030_v13 }
  0xc8   : > { %v447_v3 = vpop.permute.xlu1 %446  ;;  %v440_v6 = vpop.permute.xlu0 %439 }
  0xc9   : > { %v471_v9 = vmul.f32 %v465_v51, %v447_v3  ;;  %v470_v10 = vmul.f32 %v465_v51, %v440_v6 }
  0xcb   : > { %v479_v11 = vadd.f32 %v471_v9, %v403_v46  ;;  %v478_v7 = vadd.f32 %v470_v10, %v402_v4 }
  0xcc   : > { %v461_v12 = vpop.permute.xlu1 %460  ;;  %v454_v15 = vpop.permute.xlu0 %453 }
  0xcd   : > { %v473_v16 = vmul.f32 %v465_v51, %v461_v12  ;;  %v472_v17 = vmul.f32 %v465_v51, %v454_v15 }
  0xcf   : > { %v481_v19 = vadd.f32 %v473_v16, %v405_v52  ;;  %v480_v20 = vadd.f32 %v472_v17, %v404_v53 }
  0xd0   : > { %v495_v21 = vpop.permute.xlu1 %494  ;;  %v488_v22 = vpop.permute.xlu0 %487 }
  0xd1   : > { %v543_v8 = vmul.f32 %v541_v18, %v495_v21  ;;  %v542_v23 = vmul.f32 %v541_v18, %v488_v22 }
  0xd3   : > { %v551_v24 = vadd.f32 %v543_v8, %v475_v58  ;;  %v550_v5 = vadd.f32 %v542_v23, %v474_v59 }
  0xd4   : > { %v509_v25 = vpop.permute.xlu1 %508  ;;  %v502_v26 = vpop.permute.xlu0 %501 }
  0xd5   : > { %v545_v27 = vmul.f32 %v541_v18, %v509_v25  ;;  %v544_v28 = vmul.f32 %v541_v18, %v502_v26 }
  0xd7   : > { %v553_v29 = vadd.f32 %v545_v27, %v477_v1  ;;  %v552_v30 = vadd.f32 %v544_v28, %v476_v2 }
  0xd8   : > { %v523_v31 = vpop.permute.xlu1 %522  ;;  %v516_v32 = vpop.permute.xlu0 %515 }
  0xd9   : > { %v547_v33 = vmul.f32 %v541_v18, %v523_v31  ;;  %v546_v14 = vmul.f32 %v541_v18, %v516_v32 }
  0xdb   : > { %v555_v34 = vadd.f32 %v547_v33, %v479_v11  ;;  %v554_v35 = vadd.f32 %v546_v14, %v478_v7 }
  0xdc   : > { %v537_v36 = vpop.permute.xlu1 %536  ;;  %v530_v37 = vpop.permute.xlu0 %529 }
  0xdd   : > { %v549_v38 = vmul.f32 %v541_v18, %v537_v36  ;;  %v548_v39 = vmul.f32 %v541_v18, %v530_v37 }
  0xdf   : > { %v557_v41 = vadd.f32 %v549_v38, %v481_v19  ;;  %v556_v42 = vadd.f32 %v548_v39, %v480_v20 }
  0xe0   : > { %v571_v43 = vpop.permute.xlu1 %570  ;;  %v564_v44 = vpop.permute.xlu0 %563 }
  0xe1   : > { %v619_v45 = vmul.f32 %v617_v40, %v571_v43  ;;  %v618_v46 = vmul.f32 %v617_v40, %v564_v44 }
  0xe3   : > { %v627_v4 = vadd.f32 %v619_v45, %v551_v24  ;;  %v626_v47 = vadd.f32 %v618_v46, %v550_v5 }
  0xe4   : > { %v585_v48 = vpop.permute.xlu1 %584  ;;  %v578_v49 = vpop.permute.xlu0 %577 }
  0xe5   : > { %636 = vst.msk [vmem:[%s211_s25 + $0x8] sm:$0xff] %vm634_vm3, %v627_v4  ;;  %635 = vst.msk [vmem:[%s211_s25] sm:$0xff] %vm634_vm3, %v626_v47  ;;  %v621_v13 = vmul.f32 %v617_v40, %v585_v48  ;;  %v620_v62 = vmul.f32 %v617_v40, %v578_v49 }
  0xe7   : > { %v629_v50 = vadd.f32 %v621_v13, %v553_v29  ;;  %v628_v51 = vadd.f32 %v620_v62, %v552_v30 }
  0xe8   : > { %v599_v52 = vpop.permute.xlu1 %598  ;;  %v592_v53 = vpop.permute.xlu0 %591 }
  0xe9   : > { %638 = vst.msk [vmem:[%s211_s25 + $0x18] sm:$0xff] %vm634_vm3, %v629_v50  ;;  %637 = vst.msk [vmem:[%s211_s25 + $0x10] sm:$0xff] %vm634_vm3, %v628_v51  ;;  %v623_v54 = vmul.f32 %v617_v40, %v599_v52  ;;  %v622_v55 = vmul.f32 %v617_v40, %v592_v53 }
  0xeb   : > { %v631_v56 = vadd.f32 %v623_v54, %v555_v34  ;;  %v630_v57 = vadd.f32 %v622_v55, %v554_v35 }
  0xec   : > { %v613_v58 = vpop.permute.xlu1 %612  ;;  %v606_v59 = vpop.permute.xlu0 %605 }
  0xed   : > { %640 = vst.msk [vmem:[%s211_s25 + $0x28] sm:$0xff] %vm634_vm3, %v631_v56  ;;  %639 = vst.msk [vmem:[%s211_s25 + $0x20] sm:$0xff] %vm634_vm3, %v630_v57  ;;  %v625_v60 = vmul.f32 %v617_v40, %v613_v58  ;;  %v624_v61 = vmul.f32 %v617_v40, %v606_v59 }
  0xef   : > { %v633_v63 = vadd.f32 %v625_v60, %v557_v41  ;;  %v632_v0 = vadd.f32 %v624_v61, %v556_v42 }
  0xf1   : > { %642 = vst.msk [vmem:[%s211_s25 + $0x38] sm:$0xff] %vm634_vm3, %v633_v63  ;;  %641 = vst.msk [vmem:[%s211_s25 + $0x30] sm:$0xff] %vm634_vm3, %v632_v0 }
  0xf2   : > { %849 = shalt.err (!%p846_p10)
}
  0xf3   : > { %s850_s13 = scalar_lea.hbm %s1110_s8, 1024  ;;  %s854_s16 = scalar_lea.hbm %s1167_s4, 2048 }
  0xf4   : > { %p851_p11 = scmp.ne.s32.totalorder %s1110_s8, %s850_s13  ;;  %p855_p1 = scmp.lt.s32.totalorder %s1110_s8, %s1167_s4 }
  0xf5   : > { %p856_p2 = scmp.lt.s32.totalorder %s854_s16, %s850_s13 }
  0xf6   : > { %p852_p12 = pnand %p851_p11, %p989_p9 }
  0xf7   : > { %p857_p3 = por %p856_p2, %p855_p1 }
  0xf8   : > { %p853_p0 = pneg %p852_p12 }
  0xfa   : > { %p858_p4 = pnand %p857_p3, %p853_p0 }
  0xfc   : > { %861 = shalt.err (!%p858_p4)
}
  0xfd   : > { %s919_s19 = smov 128   ;;  %s920_s25 = smov 8  }
  0xfe   : > { %765 = dma.vmem_to_hbm [thread:$0]  (%p989_p9), %s1112_s28, 1024, %s1110_s8, %s1118_s22, %s919_s19, %s919_s19, %s920_s25  }
  0xff PF: > { %p771_p5 = scmp.ge.s32.totalorder %s914_s24, 2  ;;  %s674_s26 = sand.u32 1, %s894_s20  }
 0x100   : > { %s675_s30 = scalar_lea.sflag [#allocation5], %s674_s26 }
 0x101   : > { %p768_p6 = pnand %p771_p5, %p996_p13 }
 0x103   : > { %p769_p7 = pneg %p768_p6 }
 0x105   : > { %889 = dma.done.wait (%p769_p7), %s675_s30, 1024  }
 0x106   : > { %891 = vsyncadd (%p769_p7), %s675_s30, 4294966272  ;;  %s23_s24 = sadd.s32 1, %s914_s24   ;;  %s1170_s20 = smov %s898_s21 }
 0x107   : > { %p20_p8 = scmp.ge.s32.totalorder %s23_s24, 4   ;;  %s1171_s21 = smov %s902_s0 }
 0x108   : > { %s1172_s0 = smov %s1002_s6  ;;  %s1173_s22 = smov %s910_s23 }
 0x109   : > { %s1174_s23 = smov %s1176_s27  ;;  %22 = sbr.rel (!%p20_p8) target bundleno = 19 (0x13), region = 70 }
 0x10e   :  { %680 = vsyncpa [#allocation5], 1 }
 0x10f   :  { %682 = vsyncpa [#allocation5 + $0x1], 1 }

</bundles_post_ra>
